<compile_context>
chip_gen: v7x
topology: tpu7x:2x2x1
jax: 0.10.0
libtpu: 0.0.40
codegen_flags: <defaults>
</compile_context>

<pallas_src>
import jax
import jax.numpy as jnp
from jax.experimental import pallas as pl
from jax.experimental.pallas import tpu as pltpu


def _fused_kernel(x_ref, w_ref, cb_ref, o_ref):
    # x: (Cin, H*W)   w: (C2, Cin)   cb: (C2, 1)   o: (C2, H*W)
    y = jnp.dot(w_ref[...], x_ref[...], preferred_element_type=jnp.float32)
    o_ref[...] = (y + cb_ref[...]).astype(o_ref.dtype)


def fused_conv1x1_forward(x_nchw, params, other=1.0):
    """Pallas-fused  conv2(conv1(x) + other) + other  with 1x1 kernels, pad=1."""
    w1, b1, w2, b2 = params
    N, Cin, H, W = x_nchw.shape
    C2 = w2.shape[0]
    HW = H * W
    Hp, Wp = H + 4, W + 4          # two padding=1 convs -> +2 per side

    f32 = jnp.float32
    w1f, b1f = w1.astype(f32), b1.astype(f32)
    w2f, b2f = w2.astype(f32), b2.astype(f32)

    # ---- algebraic folding of the two 1x1 convs (+other) -------------------
    w21 = w2f @ w1f                              # (C2, Cin)
    cb_int = w2f @ (b1f + other) + b2f + other   # (C2,)  interior / ring1 bias
    cb_ring0 = b2f + other                       # (C2,)  outermost ring bias

    # Constant ring image added after the kernel:
    #   ring0 (i or j in {0, Hp-1/Wp-1})           -> cb_ring0
    #   ring1 (i or j in {1, Hp-2/Wp-2}, not ring0) -> cb_int
    #   interior                                    -> 0 (kernel result goes there)
    ii = jnp.arange(Hp)[:, None]
    jj = jnp.arange(Wp)[None, :]
    ring0 = (ii == 0) | (ii == Hp - 1) | (jj == 0) | (jj == Wp - 1)
    ring1 = ((ii == 1) | (ii == Hp - 2) | (jj == 1) | (jj == Wp - 2)) & (~ring0)
    ring_img = (ring0.astype(f32)[None, None] * cb_ring0[None, :, None, None]
                + ring1.astype(f32)[None, None] * cb_int[None, :, None, None])

    # ---- Pallas call: one matmul per image on the unpadded pixels ----------
    x_flat = x_nchw.astype(f32).reshape(N, Cin, HW)   # contiguous reshape, free
    cb_col = cb_int.reshape(C2, 1)

    out_int = pl.pallas_call(
        _fused_kernel,
        out_shape=jax.ShapeDtypeStruct((N, C2, HW), f32),
        grid_spec=pltpu.PrefetchScalarGridSpec(
            num_scalar_prefetch=0,
            grid=(N,),
            in_specs=[
                pl.BlockSpec((None, Cin, HW), lambda n: (n, 0, 0)),
                pl.BlockSpec((C2, Cin), lambda n: (0, 0)),
                pl.BlockSpec((C2, 1), lambda n: (0, 0)),
            ],
            out_specs=pl.BlockSpec((None, C2, HW), lambda n: (n, 0, 0)),
        ),
        compiler_params=pltpu.CompilerParams(
            dimension_semantics=("parallel",)),   # both TCs on v7x
    )(x_flat, w21, cb_col)

    # ---- assemble the 20x20 output: zero-pad interior by 2 + constant rings
    out = jnp.pad(out_int.reshape(N, C2, H, W),
                  ((0, 0), (0, 0), (2, 2), (2, 2))) + ring_img
    return out


def init_params(key):
    k1, k2, k3, k4 = jax.random.split(key, 4)
    # conv1: Conv2d(3, 8, 1) -> weight (8, 3), bias (8,)
    w1 = jax.random.normal(k1, (8, 3), jnp.float32) * 0.1
    b1 = jax.random.normal(k2, (8,), jnp.float32) * 0.1
    # TODO(synk): the reference module declares conv2 = Conv2d(3, 8, 1), which is
    # incompatible with v1's 8 channels (PyTorch itself would raise at runtime);
    # conv2 is built here with in_channels=8 so the chain composes.
    w2 = jax.random.normal(k3, (8, 8), jnp.float32) * 0.1
    b2 = jax.random.normal(k4, (8,), jnp.float32) * 0.1
    return w1, b1, w2, b2


def model_forward(x1, params, other=1.0):
    # NOTE: `padding2 = torch.randn(x1.shape)` in the reference forward is dead
    # code (never used), so it is not reproduced.
    # NOTE: folding `other` / W2@W1 into constants is valid because `other` is
    # a scalar; a tensor `other` would require a different (unfused) path.
    return fused_conv1x1_forward(x1, params, other=other)


def reference_forward(x1, params, other=1.0):
    """Pure-JAX (unfused, exact f32) reference of the same forward."""
    w1, b1, w2, b2 = params

    def conv1x1_pad1(x, w, b):
        xpad = jnp.pad(x, ((0, 0), (0, 0), (1, 1), (1, 1)))
        y = jnp.einsum('oc,nchw->nohw', w, xpad)
        return y + b[None, :, None, None]

    v1 = conv1x1_pad1(x1, w1, b1) + other
    v2 = conv1x1_pad1(v1, w2, b2) + other
    return v2


if __name__ == "__main__":
    key = jax.random.PRNGKey(0)
    kx, kp = jax.random.split(key)
    # small NCHW 3-channel input consistent with the module
    x1 = jax.random.normal(kx, (2, 3, 16, 16), jnp.float32)
    params = init_params(kp)

    fwd = jax.jit(lambda x, p: model_forward(x, p, other=1.0))
    out = jax.block_until_ready(fwd(x1, params))
    assert out.shape == (2, 8, 20, 20), out.shape

    ref = reference_forward(x1, params, other=1.0)
    max_err = float(jnp.max(jnp.abs(out - ref)))
    assert max_err < 1e-4, f"max abs error vs reference: {max_err}"

    print("KERNEL_OK")
</pallas_src>

<mosaic_0001>
module attributes {stable_mosaic.version = 11 : i64} {
  func.func @_fused_kernel(%arg0: i32, %arg1: memref<1x3x256xf32, #tpu.memory_space<vmem>>, %arg2: memref<8x3xf32, #tpu.memory_space<vmem>>, %arg3: memref<8x1xf32, #tpu.memory_space<vmem>>, %arg4: memref<1x8x256xf32, #tpu.memory_space<vmem>>) attributes {dimension_semantics = [#tpu.dimension_semantics<parallel>], iteration_bounds = array<i64: 2>, scalar_prefetch = 0 : i64, scratch_operands = 0 : i64, tpu.core_type = #tpu.core_type<tc>, window_params = [{transform_indices = @transform_0, window_bounds = array<i64: 1, 3, 256>}, {pipeline_mode = #tpu.pipeline_mode<synchronous>, transform_indices = @transform_1, window_bounds = array<i64: 8, 3>}, {pipeline_mode = #tpu.pipeline_mode<synchronous>, transform_indices = @transform_2, window_bounds = array<i64: 8, 1>}, {transform_indices = @transform_3, window_bounds = array<i64: 1, 8, 256>}]} {
    %c0 = arith.constant 0 : index
    %c0_0 = arith.constant 0 : index
    %0 = vector.load %arg2[%c0, %c0_0] : memref<8x3xf32, #tpu.memory_space<vmem>>, vector<8x3xf32>
    %c0_1 = arith.constant 0 : index
    %c0_2 = arith.constant 0 : index
    %c0_3 = arith.constant 0 : index
    %1 = vector.load %arg1[%c0_1, %c0_2, %c0_3] : memref<1x3x256xf32, #tpu.memory_space<vmem>>, vector<1x3x256xf32>
    %2 = vector.shape_cast %1 : vector<1x3x256xf32> to vector<3x256xf32>
    %cst = arith.constant dense<0.000000e+00> : vector<8x256xf32>
    %3 = tpu.matmul %0, %2, %cst {dimension_numbers = #tpu.dot_dimension_numbers<[1], [0], [0], [1], [0, 0, 1, 1], [], []>} : vector<8x3xf32>, vector<3x256xf32>, vector<8x256xf32> -> vector<8x256xf32>
    %c0_4 = arith.constant 0 : index
    %c0_5 = arith.constant 0 : index
    %4 = vector.load %arg3[%c0_4, %c0_5] : memref<8x1xf32, #tpu.memory_space<vmem>>, vector<8x1xf32>
    %5 = vector.broadcast %4 : vector<8x1xf32> to vector<8x256xf32>
    %6 = arith.addf %3, %5 : vector<8x256xf32>
    %c0_6 = arith.constant 0 : index
    %c0_7 = arith.constant 0 : index
    %c0_8 = arith.constant 0 : index
    %7 = vector.load %arg4[%c0_6, %c0_7, %c0_8] : memref<1x8x256xf32, #tpu.memory_space<vmem>>, vector<1x8x256xf32>
    %8 = vector.shape_cast %7 : vector<1x8x256xf32> to vector<8x256xf32>
    %9 = vector.shape_cast %6 : vector<8x256xf32> to vector<1x8x256xf32>
    tpu.vector_store %arg4[%c0_6, %c0_7, %c0_8], %9 {strides = array<i32>} : memref<1x8x256xf32, #tpu.memory_space<vmem>>, vector<1x8x256xf32>,
    return
  }
  func.func @transform_0(%arg0: i32) -> (i32, i32, i32) {
    %c0_i32 = arith.constant 0 : i32
    %c0_i32_0 = arith.constant 0 : i32
    %c0_i32_1 = arith.constant 0 : i32
    return %arg0, %c0_i32, %c0_i32_0 : i32, i32, i32
  }
  func.func @transform_1(%arg0: i32) -> (i32, i32) {
    %c0_i32 = arith.constant 0 : i32
    %c0_i32_0 = arith.constant 0 : i32
    %c0_i32_1 = arith.constant 0 : i32
    return %c0_i32, %c0_i32_0 : i32, i32
  }
  func.func @transform_2(%arg0: i32) -> (i32, i32) {
    %c0_i32 = arith.constant 0 : i32
    %c0_i32_0 = arith.constant 0 : i32
    %c0_i32_1 = arith.constant 0 : i32
    return %c0_i32, %c0_i32_0 : i32, i32
  }
  func.func @transform_3(%arg0: i32) -> (i32, i32, i32) {
    %c0_i32 = arith.constant 0 : i32
    %c0_i32_0 = arith.constant 0 : i32
    %c0_i32_1 = arith.constant 0 : i32
    return %arg0, %c0_i32, %c0_i32_0 : i32, i32, i32
  }
}

</mosaic_0001>

<bundles_post_ra>
// kernel: _lambda_.1
= control target key start
LH: loop header
LB: loop body
LE: loop exit
PB: predicated region body
PF: predicated region fallthrough
CT: control target
= control target key end

     0   :  { %s376_s12 = smov 0   ;;  %s399_s0 = inlined_call_operand.vmem [shape: f32[2,3,256], index: 0, kind: input, shape index: {}]   ;;  %s400_s1 = inlined_call_operand.vmem [shape: f32[8,3], index: 1, kind: input, shape index: {}]   ;;  %s401_s2 = inlined_call_operand.vmem [shape: f32[8,1], index: 2, kind: input, shape index: {}]   ;;  %s402_s3 = inlined_call_operand.vmem [shape: f32[2,8,256], index: 3, kind: output, shape index: {}]  }
   0x1 LB: > { %s318_s13 = sadd.s32 4294967295, %s352_s12   ;;  %p322_p0 = scmp.ge.s32.totalorder %s352_s12, 1  ;;  %s352_s12 = sphi %s376_s12, %s13_s12  }
   0x2   : > { %p137_p1 = scmp.lt.s32.totalorder %s352_s12, 3 }
   0x4   : > { %p138_p2 = pnand %p322_p0, %p137_p1 }
   0x5   : > { %p161_p3 = scmp.lt.s32.totalorder (!%p138_p2), %s318_s13, 1  ;;  %v354_v0 = vmov (!%p138_p2), 0.0   ;;  %v355_v1 = vmov (!%p138_p2), 0   ;;  %v173_v2 = vld [vmem:[%s401_s2] sm:$0xff] (!%p138_p2)  ;;  %vm185_vm0 = vcmask (!%p138_p2), 1042432   ;;  %vm181_vm1 = vcmask (!%p138_p2), 23552  }
   0x6   : > { %141 = sbr.rel (%p138_p2) target bundleno = 237 (0xed), region = 32  ;;  %254 = vmatprep.mubr.f32.mxu0 (!%p138_p2), %v354_v0  ;;  %344 = vset.pattern.permute.xlu0 (!%p138_p2), %v355_v1  ;;  %v171_v5 = vld [vmem:[%s400_s1] sm:$0xff] (!%p138_p2) }
   0x7   : > { %176 = vperm.xlu0 (!%p138_p2), %344, %v173_v2  }
   0xd   : > { %s404_s13 = smov (!%p161_p3, %s318_s13), 1 }
   0xe   : > { %s332_s16 = sshll.u32 %s404_s13, 3  ;;  %s333_s22 = sshll.u32 %s404_s13, 4 }
   0xf   : > { %s165_s19 = scalar_lea.vmem %s399_s0, %s332_s16  ;;  %s170_s25 = scalar_lea.vmem %s402_s3, %s333_s22 }
  0x10   : > { %v172_v3 = vld [vmem:[%s165_s19] sm:$0x77] }
  0x11   : > { %v180_v4 = vcombine.high %v172_v3, %v172_v3 }
  0x13   : > { %327 = vmatprep.subr.msk.mxu0 %vm185_vm0, %v180_v4 }
  0x14   : > { %328 = vmatpush1.msk.msra.mxu0 %vm185_vm0, %v172_v3 }
  0x15   : > { %329 = vmatmul.mubr.msk.f32.vlgmr.msra.gmra.mrb[0].mxu0 %vm181_vm1, %v171_v5 }
  0x86   : > { %v177_v6 = vpop.permute.xlu0 %176 }
  0xe8   : > { %v256_v7 = vpop.f32.mrb[0].mxu0 }
  0xe9   : > { %v257_v8 = vadd.f32 %v256_v7, %v177_v6  ;;  %v258_v9 = vpop.f32.mrb[1].mxu0 }
  0xea   : > { %v259_v10 = vadd.f32 %v258_v9, %v177_v6 }
  0xeb   : > { %261 = vst [vmem:[%s170_s25] sm:$0xff] %v257_v8 }
  0xec   : > { %262 = vst [vmem:[%s170_s25 + $0x8] sm:$0xff] %v259_v10 }
  0xed PF: > { %s13_s12 = sadd.s32 1, %s352_s12  }
  0xee   : > { %p10_p4 = scmp.ge.s32.totalorder %s13_s12, 4  }
  0xf0   :  { %12 = sbr.rel (!%p10_p4) target bundleno = 1 (0x1), region = 62 }

</bundles_post_ra>
